<compile_context>
chip_gen: v6e
topology: v6e:2x2x1
jax: 0.10.0
libtpu: 0.0.40
codegen_flags: <defaults>
</compile_context>

<pallas_src>
import math

import jax
import jax.numpy as jnp
from jax.experimental import pallas as pl
from jax.experimental.pallas import tpu as pltpu


_NUM_LAYERS = 8  # 7 hidden (Linear+ReLU) + 1 output Linear


def _mlp_kernel(*refs):
    # refs = (x_ref, w1..w8, b1..b8, o_ref)
    x_ref = refs[0]
    w_refs = refs[1:1 + _NUM_LAYERS]
    b_refs = refs[1 + _NUM_LAYERS:1 + 2 * _NUM_LAYERS]
    o_ref = refs[1 + 2 * _NUM_LAYERS]

    h = x_ref[...]                 # (n_feature, tile_b), lane-dense
    op_dtype = h.dtype             # MXU operand dtype (bf16 or f32)

    # 7 hidden layers: MXU matmul (f32 accumulation) + f32 bias add + f32 ReLU (VPU).
    for li in range(_NUM_LAYERS - 1):
        acc = jnp.dot(w_refs[li][...], h, preferred_element_type=jnp.float32)
        acc = acc + b_refs[li][...]              # (out_i, 1) broadcasts over lanes
        h = jnp.maximum(acc, 0.0).astype(op_dtype)

    # Output layer: Linear, no activation.  Lane-dense (n_output, tile_b) store.
    out = jnp.dot(w_refs[-1][...], h, preferred_element_type=jnp.float32)
    o_ref[...] = (out + b_refs[-1][...]).astype(o_ref.dtype)


def mlp_forward(x, weights, biases, *, tile_b=256, operand_dtype=jnp.bfloat16):
    """Forward pass equivalent to Net.forward.

    x:        (B, n_feature) float32 (PyTorch row-major convention).
    weights:  8 arrays, weights[i] shaped (out_i, in_i)  (PyTorch nn.Linear layout).
    biases:   8 arrays, biases[i]  shaped (out_i, 1).
    tile_b:   batch tile on the lane axis; multiple of 128 (128 for v5e, 256 for v6e/v7x).
    operand_dtype: MXU operand dtype (bf16 recommended on v6e/v7x); accumulation is f32.
    Returns (B, n_output) float32.
    """
    assert len(weights) == _NUM_LAYERS and len(biases) == _NUM_LAYERS
    assert tile_b % 128 == 0, "tile_b must be a multiple of the 128-lane width"
    B, n_feature = x.shape
    n_output = weights[-1].shape[0]

    # Ragged batches handled here: pad up to a multiple of tile_b (zero columns),
    # slice the padding off after the kernel.
    num_tiles = pl.cdiv(B, tile_b)
    bp = num_tiles * tile_b

    # Flip layout: batch -> lane (last) dim, then pad.
    x_t = jnp.pad(x.T.astype(operand_dtype), ((0, 0), (0, bp - B)))

    ws = [w.astype(operand_dtype) for w in weights]   # MXU operands
    bs = [b.astype(jnp.float32) for b in biases]      # bias/ReLU path stays f32

    in_specs = [pl.BlockSpec((n_feature, tile_b), lambda i: (0, i))]
    # Weights/biases: grid-invariant full blocks (constant index_map), so they are
    # fetched once and stay resident across batch tiles (~27 KiB total here; if the
    # hidden dims ever grow, single-buffer them / set vmem_limit_bytes for v7x's
    # 64 MiB VMEM).
    for w in ws:
        in_specs.append(pl.BlockSpec(w.shape, lambda i: (0, 0)))
    for b in bs:
        in_specs.append(pl.BlockSpec(b.shape, lambda i: (0, 0)))

    out_spec = pl.BlockSpec((n_output, tile_b), lambda i: (0, i))

    out_t = pl.pallas_call(
        _mlp_kernel,
        out_shape=jax.ShapeDtypeStruct((n_output, bp), jnp.float32),
        grid_spec=pltpu.PrefetchScalarGridSpec(
            num_scalar_prefetch=0,
            grid=(num_tiles,),
            in_specs=in_specs,
            out_specs=out_spec,
        ),
        compiler_params=pltpu.CompilerParams(
            # Batch tiles are independent -> shard across the 2 TensorCores on v7x.
            dimension_semantics=("parallel",)),
    )(x_t, *ws, *bs)

    return out_t[:, :B].T.astype(x.dtype)


def init_params(key, dims):
    """PyTorch nn.Linear-like init: U(-1/sqrt(fan_in), 1/sqrt(fan_in)).

    weights[i]: (out_i, in_i)   biases[i]: (out_i, 1)
    """
    weights, biases = [], []
    for i in range(len(dims) - 1):
        fan_in, fan_out = dims[i], dims[i + 1]
        key, kw, kb = jax.random.split(key, 3)
        bound = 1.0 / math.sqrt(fan_in)
        weights.append(jax.random.uniform(kw, (fan_out, fan_in), jnp.float32, -bound, bound))
        biases.append(jax.random.uniform(kb, (fan_out, 1), jnp.float32, -bound, bound))
    return weights, biases


def mlp_reference(x, weights, biases):
    h = x
    for i in range(_NUM_LAYERS - 1):
        h = jnp.maximum(h @ weights[i].T + biases[i].T, 0.0)
    return h @ weights[-1].T + biases[-1].T


if __name__ == "__main__":
    # Net(n_feature, n_hidden1..n_hidden7, n_output)
    n_feature = 16
    hidden = [32, 32, 32, 32, 32, 32, 32]
    n_output = 4
    dims = [n_feature] + hidden + [n_output]

    key = jax.random.PRNGKey(0)
    key, kx1, kx2 = jax.random.split(key, 3)
    weights, biases = init_params(key, dims)

    # Case 1: small batch, f32 MXU operands -> bit-tight check vs f32 reference.
    B1 = 16
    x1 = jax.random.normal(kx1, (B1, n_feature), jnp.float32)
    out1 = jax.block_until_ready(
        mlp_forward(x1, weights, biases, tile_b=128, operand_dtype=jnp.float32))
    ref1 = mlp_reference(x1, weights, biases)
    assert out1.shape == (B1, n_output)
    assert jnp.allclose(out1, ref1, atol=1e-5, rtol=1e-5), "f32 mismatch vs reference"

    # Case 2: ragged multi-tile batch, bf16 MXU operands (f32 accumulation) ->
    # relaxed tolerance vs the f32 reference.
    B2 = 300
    x2 = jax.random.normal(kx2, (B2, n_feature), jnp.float32)
    out2 = jax.block_until_ready(
        mlp_forward(x2, weights, biases, tile_b=128, operand_dtype=jnp.bfloat16))
    ref2 = mlp_reference(x2, weights, biases)
    assert out2.shape == (B2, n_output)
    assert jnp.allclose(out2, ref2, atol=5e-2, rtol=5e-2), "bf16 mismatch vs reference"

    print("KERNEL_OK")
</pallas_src>

<mosaic_0001>
module attributes {stable_mosaic.version = 11 : i64} {
  func.func @_mlp_kernel(%arg0: i32, %arg1: memref<16x128xf32, #tpu.memory_space<vmem>>, %arg2: memref<32x16xf32, #tpu.memory_space<vmem>>, %arg3: memref<32x32xf32, #tpu.memory_space<vmem>>, %arg4: memref<32x32xf32, #tpu.memory_space<vmem>>, %arg5: memref<32x32xf32, #tpu.memory_space<vmem>>, %arg6: memref<32x32xf32, #tpu.memory_space<vmem>>, %arg7: memref<32x32xf32, #tpu.memory_space<vmem>>, %arg8: memref<32x32xf32, #tpu.memory_space<vmem>>, %arg9: memref<4x32xf32, #tpu.memory_space<vmem>>, %arg10: memref<32x1xf32, #tpu.memory_space<vmem>>, %arg11: memref<32x1xf32, #tpu.memory_space<vmem>>, %arg12: memref<32x1xf32, #tpu.memory_space<vmem>>, %arg13: memref<32x1xf32, #tpu.memory_space<vmem>>, %arg14: memref<32x1xf32, #tpu.memory_space<vmem>>, %arg15: memref<32x1xf32, #tpu.memory_space<vmem>>, %arg16: memref<32x1xf32, #tpu.memory_space<vmem>>, %arg17: memref<4x1xf32, #tpu.memory_space<vmem>>, %arg18: memref<4x128xf32, #tpu.memory_space<vmem>>) attributes {dimension_semantics = [#tpu.dimension_semantics<parallel>], iteration_bounds = array<i64: 1>, scalar_prefetch = 0 : i64, scratch_operands = 0 : i64, tpu.core_type = #tpu.core_type<tc>, window_params = [{transform_indices = @transform_0, window_bounds = array<i64: 16, 128>}, {pipeline_mode = #tpu.pipeline_mode<synchronous>, transform_indices = @transform_1, window_bounds = array<i64: 32, 16>}, {pipeline_mode = #tpu.pipeline_mode<synchronous>, transform_indices = @transform_2, window_bounds = array<i64: 32, 32>}, {pipeline_mode = #tpu.pipeline_mode<synchronous>, transform_indices = @transform_3, window_bounds = array<i64: 32, 32>}, {pipeline_mode = #tpu.pipeline_mode<synchronous>, transform_indices = @transform_4, window_bounds = array<i64: 32, 32>}, {pipeline_mode = #tpu.pipeline_mode<synchronous>, transform_indices = @transform_5, window_bounds = array<i64: 32, 32>}, {pipeline_mode = #tpu.pipeline_mode<synchronous>, transform_indices = @transform_6, window_bounds = array<i64: 32, 32>}, {pipeline_mode = #tpu.pipeline_mode<synchronous>, transform_indices = @transform_7, window_bounds = array<i64: 32, 32>}, {pipeline_mode = #tpu.pipeline_mode<synchronous>, transform_indices = @transform_8, window_bounds = array<i64: 4, 32>}, {pipeline_mode = #tpu.pipeline_mode<synchronous>, transform_indices = @transform_9, window_bounds = array<i64: 32, 1>}, {pipeline_mode = #tpu.pipeline_mode<synchronous>, transform_indices = @transform_10, window_bounds = array<i64: 32, 1>}, {pipeline_mode = #tpu.pipeline_mode<synchronous>, transform_indices = @transform_11, window_bounds = array<i64: 32, 1>}, {pipeline_mode = #tpu.pipeline_mode<synchronous>, transform_indices = @transform_12, window_bounds = array<i64: 32, 1>}, {pipeline_mode = #tpu.pipeline_mode<synchronous>, transform_indices = @transform_13, window_bounds = array<i64: 32, 1>}, {pipeline_mode = #tpu.pipeline_mode<synchronous>, transform_indices = @transform_14, window_bounds = array<i64: 32, 1>}, {pipeline_mode = #tpu.pipeline_mode<synchronous>, transform_indices = @transform_15, window_bounds = array<i64: 32, 1>}, {pipeline_mode = #tpu.pipeline_mode<synchronous>, transform_indices = @transform_16, window_bounds = array<i64: 4, 1>}, {transform_indices = @transform_17, window_bounds = array<i64: 4, 128>}]} {
    %c0 = arith.constant 0 : index
    %c0_0 = arith.constant 0 : index
    %0 = vector.load %arg1[%c0, %c0_0] : memref<16x128xf32, #tpu.memory_space<vmem>>, vector<16x128xf32>
    %c0_1 = arith.constant 0 : index
    %c0_2 = arith.constant 0 : index
    %1 = vector.load %arg2[%c0_1, %c0_2] : memref<32x16xf32, #tpu.memory_space<vmem>>, vector<32x16xf32>
    %cst = arith.constant dense<0.000000e+00> : vector<32x128xf32>
    %2 = tpu.matmul %1, %0, %cst {dimension_numbers = #tpu.dot_dimension_numbers<[1], [0], [0], [1], [0, 0, 1, 1], [], []>} : vector<32x16xf32>, vector<16x128xf32>, vector<32x128xf32> -> vector<32x128xf32>
    %c0_3 = arith.constant 0 : index
    %c0_4 = arith.constant 0 : index
    %3 = vector.load %arg10[%c0_3, %c0_4] : memref<32x1xf32, #tpu.memory_space<vmem>>, vector<32x1xf32>
    %4 = vector.broadcast %3 : vector<32x1xf32> to vector<32x128xf32>
    %5 = arith.addf %2, %4 : vector<32x128xf32>
    %cst_5 = arith.constant 0.000000e+00 : f32
    %6 = vector.broadcast %cst_5 : f32 to vector<32x128xf32>
    %7 = arith.maximumf %5, %6 : vector<32x128xf32>
    %c0_6 = arith.constant 0 : index
    %c0_7 = arith.constant 0 : index
    %8 = vector.load %arg3[%c0_6, %c0_7] : memref<32x32xf32, #tpu.memory_space<vmem>>, vector<32x32xf32>
    %cst_8 = arith.constant dense<0.000000e+00> : vector<32x128xf32>
    %9 = tpu.matmul %8, %7, %cst_8 {dimension_numbers = #tpu.dot_dimension_numbers<[1], [0], [0], [1], [0, 0, 1, 1], [], []>} : vector<32x32xf32>, vector<32x128xf32>, vector<32x128xf32> -> vector<32x128xf32>
    %c0_9 = arith.constant 0 : index
    %c0_10 = arith.constant 0 : index
    %10 = vector.load %arg11[%c0_9, %c0_10] : memref<32x1xf32, #tpu.memory_space<vmem>>, vector<32x1xf32>
    %11 = vector.broadcast %10 : vector<32x1xf32> to vector<32x128xf32>
    %12 = arith.addf %9, %11 : vector<32x128xf32>
    %cst_11 = arith.constant 0.000000e+00 : f32
    %13 = vector.broadcast %cst_11 : f32 to vector<32x128xf32>
    %14 = arith.maximumf %12, %13 : vector<32x128xf32>
    %c0_12 = arith.constant 0 : index
    %c0_13 = arith.constant 0 : index
    %15 = vector.load %arg4[%c0_12, %c0_13] : memref<32x32xf32, #tpu.memory_space<vmem>>, vector<32x32xf32>
    %cst_14 = arith.constant dense<0.000000e+00> : vector<32x128xf32>
    %16 = tpu.matmul %15, %14, %cst_14 {dimension_numbers = #tpu.dot_dimension_numbers<[1], [0], [0], [1], [0, 0, 1, 1], [], []>} : vector<32x32xf32>, vector<32x128xf32>, vector<32x128xf32> -> vector<32x128xf32>
    %c0_15 = arith.constant 0 : index
    %c0_16 = arith.constant 0 : index
    %17 = vector.load %arg12[%c0_15, %c0_16] : memref<32x1xf32, #tpu.memory_space<vmem>>, vector<32x1xf32>
    %18 = vector.broadcast %17 : vector<32x1xf32> to vector<32x128xf32>
    %19 = arith.addf %16, %18 : vector<32x128xf32>
    %cst_17 = arith.constant 0.000000e+00 : f32
    %20 = vector.broadcast %cst_17 : f32 to vector<32x128xf32>
    %21 = arith.maximumf %19, %20 : vector<32x128xf32>
    %c0_18 = arith.constant 0 : index
    %c0_19 = arith.constant 0 : index
    %22 = vector.load %arg5[%c0_18, %c0_19] : memref<32x32xf32, #tpu.memory_space<vmem>>, vector<32x32xf32>
    %cst_20 = arith.constant dense<0.000000e+00> : vector<32x128xf32>
    %23 = tpu.matmul %22, %21, %cst_20 {dimension_numbers = #tpu.dot_dimension_numbers<[1], [0], [0], [1], [0, 0, 1, 1], [], []>} : vector<32x32xf32>, vector<32x128xf32>, vector<32x128xf32> -> vector<32x128xf32>
    %c0_21 = arith.constant 0 : index
    %c0_22 = arith.constant 0 : index
    %24 = vector.load %arg13[%c0_21, %c0_22] : memref<32x1xf32, #tpu.memory_space<vmem>>, vector<32x1xf32>
    %25 = vector.broadcast %24 : vector<32x1xf32> to vector<32x128xf32>
    %26 = arith.addf %23, %25 : vector<32x128xf32>
    %cst_23 = arith.constant 0.000000e+00 : f32
    %27 = vector.broadcast %cst_23 : f32 to vector<32x128xf32>
    %28 = arith.maximumf %26, %27 : vector<32x128xf32>
    %c0_24 = arith.constant 0 : index
    %c0_25 = arith.constant 0 : index
    %29 = vector.load %arg6[%c0_24, %c0_25] : memref<32x32xf32, #tpu.memory_space<vmem>>, vector<32x32xf32>
    %cst_26 = arith.constant dense<0.000000e+00> : vector<32x128xf32>
    %30 = tpu.matmul %29, %28, %cst_26 {dimension_numbers = #tpu.dot_dimension_numbers<[1], [0], [0], [1], [0, 0, 1, 1], [], []>} : vector<32x32xf32>, vector<32x128xf32>, vector<32x128xf32> -> vector<32x128xf32>
    %c0_27 = arith.constant 0 : index
    %c0_28 = arith.constant 0 : index
    %31 = vector.load %arg14[%c0_27, %c0_28] : memref<32x1xf32, #tpu.memory_space<vmem>>, vector<32x1xf32>
    %32 = vector.broadcast %31 : vector<32x1xf32> to vector<32x128xf32>
    %33 = arith.addf %30, %32 : vector<32x128xf32>
    %cst_29 = arith.constant 0.000000e+00 : f32
    %34 = vector.broadcast %cst_29 : f32 to vector<32x128xf32>
    %35 = arith.maximumf %33, %34 : vector<32x128xf32>
    %c0_30 = arith.constant 0 : index
    %c0_31 = arith.constant 0 : index
    %36 = vector.load %arg7[%c0_30, %c0_31] : memref<32x32xf32, #tpu.memory_space<vmem>>, vector<32x32xf32>
    %cst_32 = arith.constant dense<0.000000e+00> : vector<32x128xf32>
    %37 = tpu.matmul %36, %35, %cst_32 {dimension_numbers = #tpu.dot_dimension_numbers<[1], [0], [0], [1], [0, 0, 1, 1], [], []>} : vector<32x32xf32>, vector<32x128xf32>, vector<32x128xf32> -> vector<32x128xf32>
    %c0_33 = arith.constant 0 : index
    %c0_34 = arith.constant 0 : index
    %38 = vector.load %arg15[%c0_33, %c0_34] : memref<32x1xf32, #tpu.memory_space<vmem>>, vector<32x1xf32>
    %39 = vector.broadcast %38 : vector<32x1xf32> to vector<32x128xf32>
    %40 = arith.addf %37, %39 : vector<32x128xf32>
    %cst_35 = arith.constant 0.000000e+00 : f32
    %41 = vector.broadcast %cst_35 : f32 to vector<32x128xf32>
    %42 = arith.maximumf %40, %41 : vector<32x128xf32>
    %c0_36 = arith.constant 0 : index
    %c0_37 = arith.constant 0 : index
    %43 = vector.load %arg8[%c0_36, %c0_37] : memref<32x32xf32, #tpu.memory_space<vmem>>, vector<32x32xf32>
    %cst_38 = arith.constant dense<0.000000e+00> : vector<32x128xf32>
    %44 = tpu.matmul %43, %42, %cst_38 {dimension_numbers = #tpu.dot_dimension_numbers<[1], [0], [0], [1], [0, 0, 1, 1], [], []>} : vector<32x32xf32>, vector<32x128xf32>, vector<32x128xf32> -> vector<32x128xf32>
    %c0_39 = arith.constant 0 : index
    %c0_40 = arith.constant 0 : index
    %45 = vector.load %arg16[%c0_39, %c0_40] : memref<32x1xf32, #tpu.memory_space<vmem>>, vector<32x1xf32>
    %46 = vector.broadcast %45 : vector<32x1xf32> to vector<32x128xf32>
    %47 = arith.addf %44, %46 : vector<32x128xf32>
    %cst_41 = arith.constant 0.000000e+00 : f32
    %48 = vector.broadcast %cst_41 : f32 to vector<32x128xf32>
    %49 = arith.maximumf %47, %48 : vector<32x128xf32>
    %c0_42 = arith.constant 0 : index
    %c0_43 = arith.constant 0 : index
    %50 = vector.load %arg9[%c0_42, %c0_43] : memref<4x32xf32, #tpu.memory_space<vmem>>, vector<4x32xf32>
    %cst_44 = arith.constant dense<0.000000e+00> : vector<4x128xf32>
    %51 = tpu.matmul %50, %49, %cst_44 {dimension_numbers = #tpu.dot_dimension_numbers<[1], [0], [0], [1], [0, 0, 1, 1], [], []>} : vector<4x32xf32>, vector<32x128xf32>, vector<4x128xf32> -> vector<4x128xf32>
    %c0_45 = arith.constant 0 : index
    %c0_46 = arith.constant 0 : index
    %52 = vector.load %arg17[%c0_45, %c0_46] : memref<4x1xf32, #tpu.memory_space<vmem>>, vector<4x1xf32>
    %53 = vector.broadcast %52 : vector<4x1xf32> to vector<4x128xf32>
    %54 = arith.addf %51, %53 : vector<4x128xf32>
    %c0_47 = arith.constant 0 : index
    %c0_48 = arith.constant 0 : index
    %55 = vector.load %arg18[%c0_47, %c0_48] : memref<4x128xf32, #tpu.memory_space<vmem>>, vector<4x128xf32>
    tpu.vector_store %arg18[%c0_47, %c0_48], %54 {strides = array<i32>} : memref<4x128xf32, #tpu.memory_space<vmem>>, vector<4x128xf32>,
    return
  }
  func.func @transform_0(%arg0: i32) -> (i32, i32) {
    %c0_i32 = arith.constant 0 : i32
    %c0_i32_0 = arith.constant 0 : i32
    return %c0_i32, %arg0 : i32, i32
  }
  func.func @transform_1(%arg0: i32) -> (i32, i32) {
    %c0_i32 = arith.constant 0 : i32
    %c0_i32_0 = arith.constant 0 : i32
    %c0_i32_1 = arith.constant 0 : i32
    return %c0_i32, %c0_i32_0 : i32, i32
  }
  func.func @transform_2(%arg0: i32) -> (i32, i32) {
    %c0_i32 = arith.constant 0 : i32
    %c0_i32_0 = arith.constant 0 : i32
    %c0_i32_1 = arith.constant 0 : i32
    return %c0_i32, %c0_i32_0 : i32, i32
  }
  func.func @transform_3(%arg0: i32) -> (i32, i32) {
    %c0_i32 = arith.constant 0 : i32
    %c0_i32_0 = arith.constant 0 : i32
    %c0_i32_1 = arith.constant 0 : i32
    return %c0_i32, %c0_i32_0 : i32, i32
  }
  func.func @transform_4(%arg0: i32) -> (i32, i32) {
    %c0_i32 = arith.constant 0 : i32
    %c0_i32_0 = arith.constant 0 : i32
    %c0_i32_1 = arith.constant 0 : i32
    return %c0_i32, %c0_i32_0 : i32, i32
  }
  func.func @transform_5(%arg0: i32) -> (i32, i32) {
    %c0_i32 = arith.constant 0 : i32
    %c0_i32_0 = arith.constant 0 : i32
    %c0_i32_1 = arith.constant 0 : i32
    return %c0_i32, %c0_i32_0 : i32, i32
  }
  func.func @transform_6(%arg0: i32) -> (i32, i32) {
    %c0_i32 = arith.constant 0 : i32
    %c0_i32_0 = arith.constant 0 : i32
    %c0_i32_1 = arith.constant 0 : i32
    return %c0_i32, %c0_i32_0 : i32, i32
  }
  func.func @transform_7(%arg0: i32) -> (i32, i32) {
    %c0_i32 = arith.constant 0 : i32
    %c0_i32_0 = arith.constant 0 : i32
    %c0_i32_1 = arith.constant 0 : i32
    return %c0_i32, %c0_i32_0 : i32, i32
  }
  func.func @transform_8(%arg0: i32) -> (i32, i32) {
    %c0_i32 = arith.constant 0 : i32
    %c0_i32_0 = arith.constant 0 : i32
    %c0_i32_1 = arith.constant 0 : i32
    return %c0_i32, %c0_i32_0 : i32, i32
  }
  func.func @transform_9(%arg0: i32) -> (i32, i32) {
    %c0_i32 = arith.constant 0 : i32
    %c0_i32_0 = arith.constant 0 : i32
    %c0_i32_1 = arith.constant 0 : i32
    return %c0_i32, %c0_i32_0 : i32, i32
  }
  func.func @transform_10(%arg0: i32) -> (i32, i32) {
    %c0_i32 = arith.constant 0 : i32
    %c0_i32_0 = arith.constant 0 : i32
    %c0_i32_1 = arith.constant 0 : i32
    return %c0_i32, %c0_i32_0 : i32, i32
  }
  func.func @transform_11(%arg0: i32) -> (i32, i32) {
    %c0_i32 = arith.constant 0 : i32
    %c0_i32_0 = arith.constant 0 : i32
    %c0_i32_1 = arith.constant 0 : i32
    return %c0_i32, %c0_i32_0 : i32, i32
  }
  func.func @transform_12(%arg0: i32) -> (i32, i32) {
    %c0_i32 = arith.constant 0 : i32
    %c0_i32_0 = arith.constant 0 : i32
    %c0_i32_1 = arith.constant 0 : i32
    return %c0_i32, %c0_i32_0 : i32, i32
  }
  func.func @transform_13(%arg0: i32) -> (i32, i32) {
    %c0_i32 = arith.constant 0 : i32
    %c0_i32_0 = arith.constant 0 : i32
    %c0_i32_1 = arith.constant 0 : i32
    return %c0_i32, %c0_i32_0 : i32, i32
  }
  func.func @transform_14(%arg0: i32) -> (i32, i32) {
    %c0_i32 = arith.constant 0 : i32
    %c0_i32_0 = arith.constant 0 : i32
    %c0_i32_1 = arith.constant 0 : i32
    return %c0_i32, %c0_i32_0 : i32, i32
  }
  func.func @transform_15(%arg0: i32) -> (i32, i32) {
    %c0_i32 = arith.constant 0 : i32
    %c0_i32_0 = arith.constant 0 : i32
    %c0_i32_1 = arith.constant 0 : i32
    return %c0_i32, %c0_i32_0 : i32, i32
  }
  func.func @transform_16(%arg0: i32) -> (i32, i32) {
    %c0_i32 = arith.constant 0 : i32
    %c0_i32_0 = arith.constant 0 : i32
    %c0_i32_1 = arith.constant 0 : i32
    return %c0_i32, %c0_i32_0 : i32, i32
  }
  func.func @transform_17(%arg0: i32) -> (i32, i32) {
    %c0_i32 = arith.constant 0 : i32
    %c0_i32_0 = arith.constant 0 : i32
    return %c0_i32, %arg0 : i32, i32
  }
}

</mosaic_0001>

<bundles_post_ra>
// kernel: tpu_custom_call.1
= control target key start
LH: loop header
LB: loop body
LE: loop exit
PB: predicated region body
PF: predicated region fallthrough
CT: control target
= control target key end

     0   :  { %s1586_s0 = inlined_call_operand.vmem [shape: f32[16,128], index: 0, kind: input, shape index: {}]   ;;  %s1587_s1 = inlined_call_operand.vmem [shape: f32[32,16], index: 1, kind: input, shape index: {}]   ;;  %s1588_s2 = inlined_call_operand.vmem [shape: f32[32,32], index: 2, kind: input, shape index: {}]   ;;  %s1589_s3 = inlined_call_operand.vmem [shape: f32[32,32], index: 3, kind: input, shape index: {}]   ;;  %s1590_s4 = inlined_call_operand.vmem [shape: f32[32,32], index: 4, kind: input, shape index: {}]   ;;  %s1591_s5 = inlined_call_operand.vmem [shape: f32[32,32], index: 5, kind: input, shape index: {}]   ;;  %s1592_s6 = inlined_call_operand.vmem [shape: f32[32,32], index: 6, kind: input, shape index: {}]   ;;  %s1593_s7 = inlined_call_operand.vmem [shape: f32[32,32], index: 7, kind: input, shape index: {}]   ;;  %s1594_s8 = inlined_call_operand.vmem [shape: f32[4,32], index: 8, kind: input, shape index: {}]   ;;  %s1595_s9 = inlined_call_operand.vmem [shape: f32[32,1], index: 9, kind: input, shape index: {}]   ;;  %s1596_s10 = inlined_call_operand.vmem [shape: f32[32,1], index: 10, kind: input, shape index: {}]   ;;  %s1597_s11 = inlined_call_operand.vmem [shape: f32[32,1], index: 11, kind: input, shape index: {}]   ;;  %s1598_s12 = inlined_call_operand.vmem [shape: f32[32,1], index: 12, kind: input, shape index: {}]   ;;  %s1599_s13 = inlined_call_operand.vmem [shape: f32[32,1], index: 13, kind: input, shape index: {}]   ;;  %s1600_s14 = inlined_call_operand.vmem [shape: f32[32,1], index: 14, kind: input, shape index: {}]   ;;  %s1601_s15 = inlined_call_operand.vmem [shape: f32[32,1], index: 15, kind: input, shape index: {}]   ;;  %s1602_s16 = inlined_call_operand.vmem [shape: f32[4,1], index: 16, kind: input, shape index: {}]   ;;  %s1603_s17 = inlined_call_operand.hbm [shape: f32[4,128], index: 17, kind: output, shape index: {}]  }
   0x1   :  { %1606 = sst [smem:[#allocation5_spill]] %s1586_s0 }
   0x2   :  { %1607 = sst [smem:[#allocation6_spill]] %s1587_s1 }
   0x3   :  { %s1608_s26 = sld [smem:[#allocation5_spill]]  ;;  %vm87_vm0 = vcmask 130048   ;;  %v1280_v4 = vmov 0   ;;  %v66_v5 = vld [vmem:[%s1595_s9 + $0x18] sm:$0xff]  ;;  %v64_v7 = vld [vmem:[%s1595_s9 + $0x8] sm:$0xff]  ;;  %v65_v8 = vld [vmem:[%s1595_s9 + $0x10] sm:$0xff] }
   0x4   :  { %s1609_s30 = sld [smem:[#allocation6_spill]]  ;;  %1256 = vset.pattern.permute.xlu0 %v1280_v4  ;;  %1257 = vset.pattern.permute.xlu1 %v1280_v4  ;;  %v63_v10 = vld [vmem:[%s1595_s9] sm:$0xff]  ;;  %v196_v11 = vld [vmem:[%s1596_s10 + $0x18] sm:$0xff]  ;;  %v195_v12 = vld [vmem:[%s1596_s10 + $0x10] sm:$0xff] }
   0x5   :  { %84 = vperm.xlu0 %1256, %v66_v5   ;;  %74 = vperm.xlu1 %1257, %v64_v7  }
   0x9   :  { %v58_v0 = vld [vmem:[%s1608_s26 + $0x8] sm:$0xff]  ;;  %v57_v1 = vld [vmem:[%s1608_s26] sm:$0xff]  ;;  %79 = vperm.xlu0 %1256, %v65_v8   ;;  %69 = vperm.xlu1 %1257, %v63_v10  }
   0xa   :  { %v59_v2 = vld [vmem:[%s1609_s30] sm:$0xff]  ;;  %1147 = vmatprep.subr.mxu0 %v58_v0  ;;  %v60_v3 = vld [vmem:[%s1609_s30 + $0x8] sm:$0xff]  ;;  %v61_v6 = vld [vmem:[%s1609_s30 + $0x10] sm:$0xff] }
   0xb   :  { %1151 = vmatprep.mubr.msk.f32.mxu0 %vm87_vm0, %v59_v2  ;;  %1148 = vmatpush3.msra.mxu0 %v58_v0  ;;  %v62_v9 = vld [vmem:[%s1609_s30 + $0x18] sm:$0xff] }
   0xc   :  { %1149 = vmatprep.subr.mxu0 %v57_v1 }
   0xd   :  { %1150 = vmatpush3.msra.mxu0 %v57_v1  ;;  %214 = vperm.xlu0 %1256, %v196_v11  }
   0xe   :  { %1152 = vmatmul.mubr.msk.f32.vlgmr.msra.gmra.mxu0 %vm87_vm0, %v60_v3 }
   0xf   :  { %1154 = vmatprep.mubr.msk.f32.mxu0 %vm87_vm0, %v61_v6 }
  0x12   :  { %1155 = vmatmul.mubr.msk.f32.gmra.mxu0 %vm87_vm0, %v62_v9 }
  0x13   :  { %22 = vsyncpa [#allocation3], 0  ;;  %v194_v13 = vld [vmem:[%s1596_s10 + $0x8] sm:$0xff]  ;;  %209 = vperm.xlu1 %1257, %v195_v12   ;;  %v193_v14 = vld [vmem:[%s1596_s10] sm:$0xff]  ;;  %vm217_vm1 = vcmask 261120   ;;  %vm1282_vm2 = vmmov 0  }
  0x14   :  { %204 = vperm.xlu0 %1256, %v194_v13   ;;  %v326_v15 = vld [vmem:[%s1597_s11 + $0x18] sm:$0xff]  ;;  %v325_v16 = vld [vmem:[%s1597_s11 + $0x10] sm:$0xff]  ;;  %v324_v17 = vld [vmem:[%s1597_s11 + $0x8] sm:$0xff]  ;;  %s1283_s23 = smov [#allocation2]  }
  0x15   :  { %v323_v18 = vld [vmem:[%s1597_s11] sm:$0xff]  ;;  %v455_v19 = vld [vmem:[%s1598_s12 + $0x18] sm:$0xff]  ;;  %v454_v20 = vld [vmem:[%s1598_s12 + $0x10] sm:$0xff]  ;;  %s1051_s24 = sshll.u32 %s1283_s23, 4  ;;  %s1052_s24 = int_to_ptr.vmem [resolvable:$true] %s1051_s24 }
  0x16   :  { %v453_v21 = vld [vmem:[%s1598_s12 + $0x8] sm:$0xff]  ;;  %v452_v22 = vld [vmem:[%s1598_s12] sm:$0xff]  ;;  %v584_v23 = vld [vmem:[%s1599_s13 + $0x18] sm:$0xff]  ;;  %p1263_p1 = scmp.lt.s32.totalorder %s1052_s24, %s1052_s24 }
  0x17   :  { %199 = vperm.xlu1 %1257, %v193_v14   ;;  %v583_v24 = vld [vmem:[%s1599_s13 + $0x10] sm:$0xff]  ;;  %v582_v25 = vld [vmem:[%s1599_s13 + $0x8] sm:$0xff]  ;;  %v581_v26 = vld [vmem:[%s1599_s13] sm:$0xff] }
  0x18   :  { %344 = vperm.xlu0 %1256, %v326_v15   ;;  %v713_v27 = vld [vmem:[%s1600_s14 + $0x18] sm:$0xff]  ;;  %v712_v28 = vld [vmem:[%s1600_s14 + $0x10] sm:$0xff]  ;;  %v711_v29 = vld [vmem:[%s1600_s14 + $0x8] sm:$0xff] }
  0x19   :  { %v710_v30 = vld [vmem:[%s1600_s14] sm:$0xff]  ;;  %v842_v31 = vld [vmem:[%s1601_s15 + $0x18] sm:$0xff]  ;;  %v841_v32 = vld [vmem:[%s1601_s15 + $0x10] sm:$0xff]  ;;  %s1258_s14 = scalar_lea.vmem %s1052_s24, 64 }
  0x1a   :  { %v840_v33 = vld [vmem:[%s1601_s15 + $0x8] sm:$0xff]  ;;  %v839_v34 = vld [vmem:[%s1601_s15] sm:$0xff]  ;;  %v191_v54 = vld [vmem:[%s1588_s2 + $0x10] sm:$0xff]  ;;  %p1259_p0 = scmp.ne.s32.totalorder %s1052_s24, %s1258_s14  ;;  %p1264_p2 = scmp.lt.s32.totalorder %s1258_s14, %s1258_s14 }
  0x1b   :  { %339 = vperm.xlu1 %1257, %v325_v16   ;;  %v965_v35 = vld [vmem:[%s1602_s16] sm:$0xf]  ;;  %v190_v53 = vld [vmem:[%s1588_s2 + $0x8] sm:$0xff]  ;;  %v192_v55 = vld [vmem:[%s1588_s2 + $0x18] sm:$0xff] }
  0x1c   :  { %334 = vperm.xlu0 %1256, %v324_v17   ;;  %v189_v36 = vld [vmem:[%s1588_s2] sm:$0xff]  ;;  %v320_v9 = vld [vmem:[%s1589_s3 + $0x8] sm:$0xff]  ;;  %v321_v10 = vld [vmem:[%s1589_s3 + $0x10] sm:$0xff]  ;;  %p1265_p3 = por %p1264_p2, %p1263_p1 }
  0x1d   :  { %1165 = vmatprep.mubr.msk.f32.mxu1 %vm217_vm1, %v189_v36  ;;  %v319_v56 = vld [vmem:[%s1589_s3] sm:$0xff]  ;;  %v322_v11 = vld [vmem:[%s1589_s3 + $0x18] sm:$0xff] }
  0x1e   :  { %1179 = vmatprep.mubr.msk.f32.mxu0 %vm217_vm1, %v319_v56  ;;  %v448_v12 = vld [vmem:[%s1590_s4] sm:$0xff]  ;;  %p1266_p4 = pnand %p1265_p3, %p1259_p0 }
  0x1f   :  { %329 = vperm.xlu1 %1257, %v323_v18  }
  0x20   :  { %473 = vperm.xlu0 %1256, %v455_v19  }
  0x23   :  { %468 = vperm.xlu1 %1257, %v454_v20  }
  0x24   :  { %463 = vperm.xlu0 %1256, %v453_v21  }
  0x27   :  { %458 = vperm.xlu1 %1257, %v452_v22  }
  0x28   :  { %602 = vperm.xlu0 %1256, %v584_v23  }
  0x2b   :  { %597 = vperm.xlu1 %1257, %v583_v24  }
  0x2c   :  { %592 = vperm.xlu0 %1256, %v582_v25  }
  0x2f   :  { %587 = vperm.xlu1 %1257, %v581_v26  }
  0x30   :  { %731 = vperm.xlu0 %1256, %v713_v27  }
  0x33   :  { %726 = vperm.xlu1 %1257, %v712_v28  }
  0x34   :  { %721 = vperm.xlu0 %1256, %v711_v29   ;;  %v449_v29 = vld [vmem:[%s1590_s4 + $0x8] sm:$0xff] }
  0x37   :  { %716 = vperm.xlu1 %1257, %v710_v30   ;;  %v450_v30 = vld [vmem:[%s1590_s4 + $0x10] sm:$0xff] }
  0x38   :  { %860 = vperm.xlu0 %1256, %v842_v31   ;;  %v451_v31 = vld [vmem:[%s1590_s4 + $0x18] sm:$0xff] }
  0x3b   :  { %855 = vperm.xlu1 %1257, %v841_v32   ;;  %v577_v32 = vld [vmem:[%s1591_s5] sm:$0xff] }
  0x3c   :  { %850 = vperm.xlu0 %1256, %v840_v33  }
  0x3f   :  { %845 = vperm.xlu1 %1257, %v839_v34  }
  0x40   :  { %968 = vperm.xlu0 %1256, %v965_v35  }
  0x80   :  { %v85_v37 = vpop.permute.xlu0 %84  ;;  %v75_v39 = vpop.permute.xlu1 %74 }
  0x84   :  { %v80_v43 = vpop.permute.xlu0 %79  ;;  %v70_v48 = vpop.permute.xlu1 %69 }
  0x88   :  { %v215_v57 = vpop.permute.xlu0 %214 }
  0x8e   :  { %v210_v59 = vpop.permute.xlu1 %209 }
  0x8f   :  { %v205_v63 = vpop.permute.xlu0 %204 }
  0x92   :  { %v200_v4 = vpop.permute.xlu1 %199 }
  0x93   :  { %v345_v13 = vpop.permute.xlu0 %344 }
  0x96   :  { %v340_v15 = vpop.permute.xlu1 %339 }
  0x97   :  { %v335_v19 = vpop.permute.xlu0 %334 }
  0x9a   :  { %v330_v24 = vpop.permute.xlu1 %329 }
  0x9b   :  { %v474_v33 = vpop.permute.xlu0 %473 }
  0x9e   :  { %v469_v35 = vpop.permute.xlu1 %468 }
  0xce   :  { %v1153_v38 = vpop.f32.mrf.mxu0 }
  0xcf   :  { %v172_v45 = vadd.f32 %v1153_v38, %v75_v39  ;;  %v464_v39 = vpop.permute.xlu0 %463 }
  0xd0   :  { %v166_v40 = vpop.f32.mrf.mxu0 }
  0xd1   :  { %v167_v49 = vadd.f32 %v166_v40, %v70_v48  ;;  %v186_v51 = vmax.f32 %v172_v45, 0.0 }
  0xd2   :  { %v1156_v41 = vpop.f32.mrf.mxu0 }
  0xd3   :  { %v182_v42 = vadd.f32 %v1156_v41, %v85_v37  ;;  %v185_v52 = vmax.f32 %v167_v49, 0.0  ;;  %v578_v49 = vld [vmem:[%s1591_s5 + $0x8] sm:$0xff] }
  0xd4   :  { %v176_v44 = vpop.f32.mrf.mxu0 }
  0xd5   :  { %v188_v46 = vmax.f32 %v182_v42, 0.0  ;;  %v177_v47 = vadd.f32 %v176_v44, %v80_v43  ;;  %v459_v44 = vpop.permute.xlu1 %458 }
  0xd7   :  { %v187_v50 = vmax.f32 %v177_v47, 0.0  ;;  %1157 = vmatprep.subr.mxu1 %v188_v46 }
  0xd8   :  { %1158 = vmatpush3.msra.mxu1 %v188_v46 }
  0xd9   :  { %1159 = vmatprep.subr.mxu1 %v187_v50 }
  0xda   :  { %1160 = vmatpush3.msra.mxu1 %v187_v50  ;;  %v579_v50 = vld [vmem:[%s1591_s5 + $0x10] sm:$0xff] }
  0xdb   :  { %1161 = vmatprep.subr.mxu1 %v186_v51 }
  0xdc   :  { %1162 = vmatpush3.msra.mxu1 %v186_v51  ;;  %v580_v51 = vld [vmem:[%s1591_s5 + $0x18] sm:$0xff] }
  0xdd   :  { %1163 = vmatprep.subr.mxu1 %v185_v52 }
  0xde   :  { %1164 = vmatpush3.msra.mxu1 %v185_v52  ;;  %v706_v52 = vld [vmem:[%s1592_s6] sm:$0xff] }
  0xdf   :  { %1166 = vmatmul.mubr.msk.f32.vlgmr.msra.gmra.mxu1 %vm217_vm1, %v190_v53  ;;  %v603_v53 = vpop.permute.xlu0 %602 }
  0xe0   :  { %1168 = vmatprep.mubr.msk.f32.mxu1 %vm217_vm1, %v191_v54 }
  0xe3   :  { %1169 = vmatmul.mubr.msk.f32.gmra.mxu1 %vm217_vm1, %v192_v55  ;;  %v598_v55 = vpop.permute.xlu1 %597 }
  0xe4   :  { %1193 = vmatprep.mubr.msk.f32.mxu1 %vm217_vm1, %v448_v12 }
 0x19f   :  { %v1167_v58 = vpop.f32.mrf.mxu1 }
 0x1a0   :  { %v302_v1 = vadd.f32 %v1167_v58, %v205_v63 }
 0x1a1   :  { %v296_v60 = vpop.f32.mrf.mxu1 }
 0x1a2   :  { %v297_v5 = vadd.f32 %v296_v60, %v200_v4  ;;  %v316_v7 = vmax.f32 %v302_v1, 0.0 }
 0x1a3   :  { %v1170_v61 = vpop.f32.mrf.mxu1 }
 0x1a4   :  { %v312_v62 = vadd.f32 %v1170_v61, %v215_v57  ;;  %v315_v8 = vmax.f32 %v297_v5, 0.0  ;;  %v707_v5 = vld [vmem:[%s1592_s6 + $0x8] sm:$0xff] }
 0x1a5   :  { %v306_v0 = vpop.f32.mrf.mxu1 }
 0x1a6   :  { %v318_v2 = vmax.f32 %v312_v62, 0.0  ;;  %v307_v3 = vadd.f32 %v306_v0, %v210_v59  ;;  %v593_v59 = vpop.permute.xlu0 %592  ;;  %v588_v0 = vpop.permute.xlu1 %587 }
 0x1a8   :  { %v317_v6 = vmax.f32 %v307_v3, 0.0  ;;  %1171 = vmatprep.subr.mxu0 %v318_v2 }
 0x1a9   :  { %1172 = vmatpush3.msra.mxu0 %v318_v2 }
 0x1aa   :  { %1173 = vmatprep.subr.mxu0 %v317_v6 }
 0x1ab   :  { %1174 = vmatpush3.msra.mxu0 %v317_v6  ;;  %v708_v6 = vld [vmem:[%s1592_s6 + $0x10] sm:$0xff] }
 0x1ac   :  { %1175 = vmatprep.subr.mxu0 %v316_v7 }
 0x1ad   :  { %1176 = vmatpush3.msra.mxu0 %v316_v7  ;;  %v709_v7 = vld [vmem:[%s1592_s6 + $0x18] sm:$0xff] }
 0x1ae   :  { %1177 = vmatprep.subr.mxu0 %v315_v8 }
 0x1af   :  { %1178 = vmatpush3.msra.mxu0 %v315_v8  ;;  %v835_v8 = vld [vmem:[%s1593_s7] sm:$0xff] }
 0x1b0   :  { %1180 = vmatmul.mubr.msk.f32.vlgmr.msra.gmra.mxu0 %vm217_vm1, %v320_v9  ;;  %v732_v9 = vpop.permute.xlu0 %731 }
 0x1b1   :  { %1182 = vmatprep.mubr.msk.f32.mxu0 %vm217_vm1, %v321_v10 }
 0x1b4   :  { %1183 = vmatmul.mubr.msk.f32.gmra.mxu0 %vm217_vm1, %v322_v11  ;;  %v727_v11 = vpop.permute.xlu1 %726 }
 0x1b5   :  { %1207 = vmatprep.mubr.msk.f32.mxu0 %vm217_vm1, %v577_v32 }
 0x270   :  { %v1181_v14 = vpop.f32.mrf.mxu0 }
 0x271   :  { %v431_v21 = vadd.f32 %v1181_v14, %v335_v19 }
 0x272   :  { %v425_v16 = vpop.f32.mrf.mxu0 }
 0x273   :  { %v426_v25 = vadd.f32 %v425_v16, %v330_v24  ;;  %v445_v27 = vmax.f32 %v431_v21, 0.0 }
 0x274   :  { %v1184_v17 = vpop.f32.mrf.mxu0 }
 0x275   :  { %v441_v18 = vadd.f32 %v1184_v17, %v345_v13  ;;  %v444_v28 = vmax.f32 %v426_v25, 0.0  ;;  %v836_v25 = vld [vmem:[%s1593_s7 + $0x8] sm:$0xff] }
 0x276   :  { %v435_v20 = vpop.f32.mrf.mxu0 }
 0x277   :  { %v447_v22 = vmax.f32 %v441_v18, 0.0  ;;  %v436_v23 = vadd.f32 %v435_v20, %v340_v15  ;;  %v722_v15 = vpop.permute.xlu0 %721  ;;  %v717_v20 = vpop.permute.xlu1 %716 }
 0x279   :  { %v446_v26 = vmax.f32 %v436_v23, 0.0  ;;  %1185 = vmatprep.subr.mxu1 %v447_v22 }
 0x27a   :  { %1186 = vmatpush3.msra.mxu1 %v447_v22 }
 0x27b   :  { %1187 = vmatprep.subr.mxu1 %v446_v26 }
 0x27c   :  { %1188 = vmatpush3.msra.mxu1 %v446_v26  ;;  %v837_v26 = vld [vmem:[%s1593_s7 + $0x10] sm:$0xff] }
 0x27d   :  { %1189 = vmatprep.subr.mxu1 %v445_v27 }
 0x27e   :  { %1190 = vmatpush3.msra.mxu1 %v445_v27  ;;  %v838_v27 = vld [vmem:[%s1593_s7 + $0x18] sm:$0xff] }
 0x27f   :  { %1191 = vmatprep.subr.mxu1 %v444_v28 }
 0x280   :  { %1192 = vmatpush3.msra.mxu1 %v444_v28  ;;  %v1281_v28 = vmov 0.0  }
 0x281   :  { %1194 = vmatmul.mubr.msk.f32.vlgmr.msra.gmra.mxu1 %vm217_vm1, %v449_v29  ;;  %v861_v29 = vpop.permute.xlu0 %860 }
 0x282   :  { %1196 = vmatprep.mubr.msk.f32.mxu1 %vm217_vm1, %v450_v30 }
 0x285   :  { %1197 = vmatmul.mubr.msk.f32.gmra.mxu1 %vm217_vm1, %v451_v31  ;;  %v856_v31 = vpop.permute.xlu1 %855 }
 0x286   :  { %1221 = vmatprep.mubr.msk.f32.mxu1 %vm217_vm1, %v706_v52 }
 0x341   :  { %v1195_v34 = vpop.f32.mrf.mxu1 }
 0x342   :  { %v560_v41 = vadd.f32 %v1195_v34, %v464_v39 }
 0x343   :  { %v554_v36 = vpop.f32.mrf.mxu1 }
 0x344   :  { %v555_v45 = vadd.f32 %v554_v36, %v459_v44  ;;  %v574_v47 = vmax.f32 %v560_v41, 0.0 }
 0x345   :  { %v1198_v37 = vpop.f32.mrf.mxu1 }
 0x346   :  { %v570_v38 = vadd.f32 %v1198_v37, %v474_v33  ;;  %v573_v48 = vmax.f32 %v555_v45, 0.0  ;;  %v964_v45 = vld [vmem:[%s1594_s8] sm:$0xf] }
 0x347   :  { %v564_v40 = vpop.f32.mrf.mxu1 }
 0x348   :  { %v576_v42 = vmax.f32 %v570_v38, 0.0  ;;  %v565_v43 = vadd.f32 %v564_v40, %v469_v35  ;;  %v851_v35 = vpop.permute.xlu0 %850  ;;  %v846_v40 = vpop.permute.xlu1 %845 }
 0x34a   :  { %v575_v46 = vmax.f32 %v565_v43, 0.0  ;;  %1199 = vmatprep.subr.mxu0 %v576_v42 }
 0x34b   :  { %1200 = vmatpush3.msra.mxu0 %v576_v42 }
 0x34c   :  { %1201 = vmatprep.subr.mxu0 %v575_v46 }
 0x34d   :  { %1202 = vmatpush3.msra.mxu0 %v575_v46  ;;  %v969_v46 = vpop.permute.xlu0 %968 }
 0x34e   :  { %1203 = vmatprep.subr.mxu0 %v574_v47 }
 0x34f   :  { %1204 = vmatpush3.msra.mxu0 %v574_v47 }
 0x350   :  { %1205 = vmatprep.subr.mxu0 %v573_v48 }
 0x351   :  { %1206 = vmatpush3.msra.mxu0 %v573_v48 }
 0x352   :  { %1208 = vmatmul.mubr.msk.f32.vlgmr.msra.gmra.mxu0 %vm217_vm1, %v578_v49 }
 0x353   :  { %1210 = vmatprep.mubr.msk.f32.mxu0 %vm217_vm1, %v579_v50 }
 0x356   :  { %1211 = vmatmul.mubr.msk.f32.gmra.mxu0 %vm217_vm1, %v580_v51 }
 0x357   :  { %1235 = vmatprep.mubr.msk.f32.mxu0 %vm217_vm1, %v835_v8 }
 0x412   :  { %v1209_v54 = vpop.f32.mrf.mxu0 }
 0x413   :  { %v689_v61 = vadd.f32 %v1209_v54, %v593_v59 }
 0x414   :  { %v683_v56 = vpop.f32.mrf.mxu0 }
 0x415   :  { %v684_v1 = vadd.f32 %v683_v56, %v588_v0  ;;  %v703_v3 = vmax.f32 %v689_v61, 0.0 }
 0x416   :  { %v1212_v57 = vpop.f32.mrf.mxu0 }
 0x417   :  { %v699_v58 = vadd.f32 %v1212_v57, %v603_v53  ;;  %v702_v4 = vmax.f32 %v684_v1, 0.0 }
 0x418   :  { %v693_v60 = vpop.f32.mrf.mxu0 }
 0x419   :  { %v705_v62 = vmax.f32 %v699_v58, 0.0  ;;  %v694_v63 = vadd.f32 %v693_v60, %v598_v55 }
 0x41b   :  { %v704_v2 = vmax.f32 %v694_v63, 0.0  ;;  %1213 = vmatprep.subr.mxu1 %v705_v62 }
 0x41c   :  { %1214 = vmatpush3.msra.mxu1 %v705_v62 }
 0x41d   :  { %1215 = vmatprep.subr.mxu1 %v704_v2 }
 0x41e   :  { %1216 = vmatpush3.msra.mxu1 %v704_v2 }
 0x41f   :  { %1217 = vmatprep.subr.mxu1 %v703_v3 }
 0x420   :  { %1218 = vmatpush3.msra.mxu1 %v703_v3 }
 0x421   :  { %1219 = vmatprep.subr.mxu1 %v702_v4 }
 0x422   :  { %1220 = vmatpush3.msra.mxu1 %v702_v4 }
 0x423   :  { %1222 = vmatmul.mubr.msk.f32.vlgmr.msra.gmra.mxu1 %vm217_vm1, %v707_v5  ;;  %1241 = vmatprep.subr.mxu1 %v1281_v28 }
 0x424   :  { %1224 = vmatprep.mubr.msk.f32.mxu1 %vm217_vm1, %v708_v6 }
 0x427   :  { %1225 = vmatmul.mubr.msk.f32.gmra.mxu1 %vm217_vm1, %v709_v7 }
 0x428   :  { %1249 = vmatprep.mubr.msk.f32.mxu1 %vm1282_vm2, %v1281_v28 }
 0x4e3   :  { %v1223_v10 = vpop.f32.mrf.mxu1 }
 0x4e4   :  { %v818_v17 = vadd.f32 %v1223_v10, %v722_v15 }
 0x4e5   :  { %v812_v12 = vpop.f32.mrf.mxu1 }
 0x4e6   :  { %v813_v21 = vadd.f32 %v812_v12, %v717_v20  ;;  %v832_v23 = vmax.f32 %v818_v17, 0.0 }
 0x4e7   :  { %v1226_v13 = vpop.f32.mrf.mxu1 }
 0x4e8   :  { %v828_v14 = vadd.f32 %v1226_v13, %v732_v9  ;;  %v831_v24 = vmax.f32 %v813_v21, 0.0 }
 0x4e9   :  { %v822_v16 = vpop.f32.mrf.mxu1 }
 0x4ea   :  { %v834_v18 = vmax.f32 %v828_v14, 0.0  ;;  %v823_v19 = vadd.f32 %v822_v16, %v727_v11 }
 0x4ec   :  { %v833_v22 = vmax.f32 %v823_v19, 0.0  ;;  %1227 = vmatprep.subr.mxu0 %v834_v18 }
 0x4ed   :  { %1228 = vmatpush3.msra.mxu0 %v834_v18 }
 0x4ee   :  { %1229 = vmatprep.subr.mxu0 %v833_v22 }
 0x4ef   :  { %1230 = vmatpush3.msra.mxu0 %v833_v22 }
 0x4f0   :  { %1231 = vmatprep.subr.mxu0 %v832_v23 }
 0x4f1   :  { %1232 = vmatpush3.msra.mxu0 %v832_v23 }
 0x4f2   :  { %1233 = vmatprep.subr.mxu0 %v831_v24 }
 0x4f3   :  { %1234 = vmatpush3.msra.mxu0 %v831_v24 }
 0x4f4   :  { %1236 = vmatmul.mubr.msk.f32.vlgmr.msra.gmra.mxu0 %vm217_vm1, %v836_v25 }
 0x4f5   :  { %1238 = vmatprep.mubr.msk.f32.mxu0 %vm217_vm1, %v837_v26 }
 0x4f8   :  { %1239 = vmatmul.mubr.msk.f32.gmra.mxu0 %vm217_vm1, %v838_v27 }
 0x5b4   :  { %v1237_v30 = vpop.f32.mrf.mxu0 }
 0x5b5   :  { %v947_v37 = vadd.f32 %v1237_v30, %v851_v35 }
 0x5b6   :  { %v941_v32 = vpop.f32.mrf.mxu0 }
 0x5b7   :  { %v942_v41 = vadd.f32 %v941_v32, %v846_v40  ;;  %v961_v43 = vmax.f32 %v947_v37, 0.0 }
 0x5b8   :  { %v1240_v33 = vpop.f32.mrf.mxu0 }
 0x5b9   :  { %v957_v34 = vadd.f32 %v1240_v33, %v861_v29  ;;  %v960_v44 = vmax.f32 %v942_v41, 0.0 }
 0x5ba   :  { %v951_v36 = vpop.f32.mrf.mxu0 }
 0x5bb   :  { %v963_v38 = vmax.f32 %v957_v34, 0.0  ;;  %v952_v39 = vadd.f32 %v951_v36, %v856_v31 }
 0x5bd   :  { %v962_v42 = vmax.f32 %v952_v39, 0.0  ;;  %1242 = vmatpush3.msra.mxu1 %v963_v38 }
 0x5be   :  { %1243 = vmatprep.subr.mxu1 %v1281_v28 }
 0x5bf   :  { %1244 = vmatpush3.msra.mxu1 %v962_v42 }
 0x5c0   :  { %1245 = vmatprep.subr.mxu1 %v1281_v28 }
 0x5c1   :  { %1246 = vmatpush3.msra.mxu1 %v961_v43 }
 0x5c2   :  { %1247 = vmatprep.subr.mxu1 %v1281_v28 }
 0x5c3   :  { %1248 = vmatpush3.msra.mxu1 %v960_v44 }
 0x5c4   :  { %1250 = vmatmul.mubr.msk.f32.vlgmr.msra.gmra.mxu1 %vm217_vm1, %v964_v45 }
 0x684   :  { %v1040_v47 = vpop.f32.mrf.mxu1 }
 0x685   :  { %v1041_v48 = vadd.f32 %v1040_v47, %v969_v46 }
 0x686   :  { %v1251_v49 = vpop.f32.mrf.mxu1 }
 0x687   :  { %1044 = vst [vmem:[#allocation2] sm:$0xf] %v1041_v48 }
 0x688   :  { %1269 = shalt.err (!%p1266_p4)
}
 0x689   :  { %1054 = dma.vmem_to_hbm [thread:$0]  %s1052_s24, 64, %s1603_s17, [#allocation3]  }
 0x68a   :  { %1278 = dma.done.wait [#allocation3], 64  }
 0x68b   :  { %1279 = vsyncadd [#allocation3], 4294967232 }
 0x68c   :  { %1058 = vsyncpa [#allocation3], 1 }

</bundles_post_ra>
